<compile_context>
chip_gen: v7x
topology: tpu7x:2x2x1
jax: 0.10.0
libtpu: 0.0.40
codegen_flags: <defaults>
</compile_context>

<pallas_src>
import functools

import jax
import jax.numpy as jnp
from jax.experimental import pallas as pl
from jax.experimental.pallas import tpu as pltpu


def _round_up(x, m):
    return ((x + m - 1) // m) * m


def _vmem_capacity_bytes():
    """Physical VMEM per TensorCore (generation-aware, with safe fallbacks)."""
    try:
        return int(pltpu.get_tpu_info().vmem_capacity_bytes)
    except Exception:
        pass
    try:
        kind = jax.devices()[0].device_kind.lower()
        if "v7" in kind:
            return 64 << 20
    except Exception:
        pass
    return 128 << 20


def _vmem_budget_bytes():
    cap = _vmem_capacity_bytes()
    # Leave headroom for compiler-internal scratch / Mosaic spills:
    #   v7x (64 MiB physical)  -> ~48 MiB usable
    #   v5e/v6e (128 MiB)      -> ~100 MiB usable
    return int(min(cap - (16 << 20), int(0.8 * cap)))


def _vmem_limit(footprint_bytes, budget_bytes):
    return int(min(budget_bytes,
                   max(int(1.3 * footprint_bytes) + (8 << 20), 16 << 20)))


def _tensorcores_per_device():
    """Heuristic TC count per device (2 on megacore-style chips, e.g. v7x)."""
    try:
        kind = jax.devices()[0].device_kind.lower()
    except Exception:
        return 1
    for tag, cores in (("v7", 2), ("v5p", 2), ("v4", 2)):
        if tag in kind:
            return cores
    return 1


def _overlap_gcn_resident_kernel(graph_ref, emb_ref, out_ref, *, layers,
                                 operand_dtype):
    """Everything VMEM-resident; out_ref is the accumulator; layers unrolled."""
    g = graph_ref[...]                       # (N, N), already operand_dtype
    cur = emb_ref[...]                       # (N, Dp) f32
    out_ref[...] = cur                       # accumulator starts at emb
    for _ in range(layers):                  # small static int -> unrolled MXU
        cur = jnp.dot(g, cur.astype(operand_dtype),
                      preferred_element_type=jnp.float32)
        out_ref[...] += cur


def _overlap_gcn_tiled_kernel(graph_ref, emb_hbm, out_ref, cur_ref, *,
                              n_rows, col_tile, carry_dtype):
    """Streaming variant for graphs that do not fit VMEM.

    grid = (n_col, layers, N // tm)
      graph_ref : (tm, N) row stripe, streamed from HBM (operand dtype).
      emb_hbm   : (N, Dp) f32 left in HBM; the current column slab is DMA'd
                  exactly once per column block in the init branch.
      out_ref   : (N, dc) f32 resident accumulator (one column slab).
      cur_ref   : (2*N, dc) ping-pong carry of G^l @ emb (operand dtype).
    """
    tm = graph_ref.shape[0]
    n = n_rows
    col = pl.program_id(0)
    layer = pl.program_id(1)
    row = pl.program_id(2)

    @pl.when(jnp.logical_and(layer == 0, row == 0))
    def _init():
        # One-shot DMA of this column slab of the embedding; emb never needs a
        # resident / double-buffered BlockSpec block.
        pltpu.sync_copy(
            emb_hbm.at[pl.ds(0, n),
                       pl.ds(pl.multiple_of(col * col_tile, col_tile),
                             col_tile)],
            out_ref)
        cur_ref[pl.ds(0, n), :] = out_ref[...].astype(carry_dtype)

    src = layer % 2
    dst = 1 - src
    row0 = pl.multiple_of(row * tm, tm)

    g = graph_ref[...]                                           # (tm, N)
    cur = cur_ref[pl.ds(pl.multiple_of(src * n, n), n), :]       # (N, dc)
    nxt = jnp.dot(g, cur, preferred_element_type=jnp.float32)    # (tm, dc) f32

    cur_ref[pl.ds(pl.multiple_of(dst * n + row * tm, tm), tm), :] = (
        nxt.astype(carry_dtype))
    out_ref[pl.ds(row0, tm), :] = out_ref[pl.ds(row0, tm), :] + nxt


def overlap_graph_convolution(graph, embedding, layers, *,
                              operand_dtype=jnp.float32,
                              max_row_tile=1024,
                              force_tiled=False,
                              num_column_blocks=None):
    """Pallas TPU implementation of OverlapGraphConvolution.forward."""
    n, d = embedding.shape
    assert graph.shape == (n, n)

    # Wrapper-side casts: the graph is stored/streamed in operand_dtype (bf16
    # halves HBM traffic and graph VMEM footprint); accumulation stays f32.
    graph = graph.astype(operand_dtype)
    embedding = embedding.astype(jnp.float32)

    if layers == 0:
        return embedding

    op_bytes = jnp.dtype(operand_dtype).itemsize

    # Lane-dense hidden dim: pad D to a multiple of 128 (sliced off afterwards).
    d_pad = _round_up(max(d, 1), 128)
    emb_p = embedding if d_pad == d else jnp.pad(
        embedding, ((0, 0), (0, d_pad - d)))

    vmem_budget = _vmem_budget_bytes()

    graph_bytes = n * n * op_bytes
    embout_bytes = n * d_pad * 4
    # Buffered(1) blocks: graph + emb + out, plus ~2 (N, Dp) f32 temporaries
    # (cur carry + MXU-operand cast) of working space.
    resident_footprint = graph_bytes + 4 * embout_bytes

    use_resident = (not force_tiled) and resident_footprint <= vmem_budget

    if use_resident:
        kernel = functools.partial(_overlap_gcn_resident_kernel,
                                   layers=layers, operand_dtype=operand_dtype)
        out_p = pl.pallas_call(
            kernel,
            out_shape=jax.ShapeDtypeStruct((n, d_pad), jnp.float32),
            grid_spec=pltpu.PrefetchScalarGridSpec(
                num_scalar_prefetch=0,
                grid=(1,),
                in_specs=[
                    # Single-buffered: each block is DMA'd exactly once.
                    pl.BlockSpec((n, n), lambda i: (0, 0),
                                 pipeline_mode=pl.Buffered(1)),
                    pl.BlockSpec((n, d_pad), lambda i: (0, 0),
                                 pipeline_mode=pl.Buffered(1)),
                ],
                out_specs=pl.BlockSpec((n, d_pad), lambda i: (0, 0),
                                       pipeline_mode=pl.Buffered(1)),
            ),
            compiler_params=pltpu.CompilerParams(
                dimension_semantics=("arbitrary",),
                vmem_limit_bytes=_vmem_limit(resident_footprint, vmem_budget)),
        )(graph, emb_p)
        return out_p[:, :d] if d_pad != d else out_p

    # ------------------------- streaming (row-tiled) path -------------------
    carry_dtype = operand_dtype          # carry in operand dtype; acc stays f32
    carry_bytes = op_bytes

    # Column split so v7x's two TensorCores both get work (column slabs of
    # cur/out are fully independent -> the axis can be "parallel").  On
    # single-TC chips this stays at one column block (no graph re-streaming).
    n_col_req = (num_column_blocks if num_column_blocks is not None
                 else _tensorcores_per_device())
    if n_col_req > 1 and d_pad >= 256:
        dc = max(128, ((d_pad // n_col_req) // 128) * 128)
        while d_pad % dc != 0:
            dc -= 128
    else:
        dc = d_pad
    n_col = d_pad // dc

    stripe_bufs = 3
    # Resident tiled VMEM: out block + ping-pong carry + ~1 slab of temps.
    resident_tiled = (n * dc * 4) + (2 * n * dc * carry_bytes) \
        + n * dc * (carry_bytes + 4)
    stripe_budget = vmem_budget - resident_tiled - (4 << 20)

    tm = None
    if n % 8 == 0 and stripe_budget > 0:
        tm_cap = min(n, max_row_tile,
                     stripe_budget // (stripe_bufs * n * op_bytes))
        for cand in (1024, 512, 256, 128, 64, 32, 16, 8):
            if cand <= tm_cap and n % cand == 0:
                tm = cand
                break
    if tm is None:
        # TODO(synk): N not a multiple of 8 (or graph too large even for an
        # 8-row stripe) would need row padding / an HBM-carried `cur`.
        tm = n

    tiled_footprint = resident_tiled + stripe_bufs * tm * n * op_bytes

    kernel = functools.partial(_overlap_gcn_tiled_kernel,
                               n_rows=n, col_tile=dc, carry_dtype=carry_dtype)
    out_p = pl.pallas_call(
        kernel,
        out_shape=jax.ShapeDtypeStruct((n, d_pad), jnp.float32),
        grid_spec=pltpu.PrefetchScalarGridSpec(
            num_scalar_prefetch=0,
            grid=(n_col, layers, n // tm),
            in_specs=[
                # Graph row stripe (operand dtype), streamed once per layer per
                # column block; triple-buffered to hide DMA issue latency.
                pl.BlockSpec((tm, n), lambda c, l, i: (i, 0),
                             pipeline_mode=pl.Buffered(stripe_bufs)),
                # Embedding stays in HBM; copied once per column block in-kernel.
                pl.BlockSpec(memory_space=pl.ANY),
            ],
            # Resident accumulator (one column slab); single-buffered, written
            # back to HBM once per column block.
            out_specs=pl.BlockSpec((n, dc), lambda c, l, i: (0, c),
                                   pipeline_mode=pl.Buffered(1)),
            scratch_shapes=[pltpu.VMEM((2 * n, dc), carry_dtype)],
        ),
        compiler_params=pltpu.CompilerParams(
            # Column slabs are independent -> "parallel" (uses both v7x cores).
            # The layer/row carry lives in per-core VMEM scratch -> "arbitrary".
            dimension_semantics=("parallel", "arbitrary", "arbitrary"),
            vmem_limit_bytes=_vmem_limit(tiled_footprint, vmem_budget)),
    )(graph, emb_p)

    return out_p[:, :d] if d_pad != d else out_p


def _reference(graph, embedding, layers):
    cur = embedding
    acc = embedding
    for _ in range(layers):
        cur = graph @ cur
        acc = acc + cur
    return acc


if __name__ == "__main__":
    # Small, deterministic synthetic problem.
    N = 64      # number of groups (graph nodes)
    D = 32      # embedding dim
    LAYERS = 3  # propagation layers

    key = jax.random.PRNGKey(0)
    k_graph, k_emb = jax.random.split(key)

    # Deterministic "normalized adjacency"-like graph and embedding.
    graph = jax.random.uniform(k_graph, (N, N), dtype=jnp.float32)
    graph = graph / jnp.sum(graph, axis=1, keepdims=True)  # row-normalize
    embedding = jax.random.normal(k_emb, (N, D), dtype=jnp.float32)

    ref = _reference(graph, embedding, LAYERS)

    # 1) Resident path, f32 MXU operands.
    out = jax.block_until_ready(
        overlap_graph_convolution(graph, embedding, LAYERS))
    assert out.shape == (N, D)
    assert jnp.allclose(out, ref, atol=1e-4, rtol=1e-4), (
        f"f32 max abs err {jnp.max(jnp.abs(out - ref))}")

    # 2) Resident path, bf16 MXU operands / f32 accumulation.
    out_bf16 = jax.block_until_ready(
        overlap_graph_convolution(graph, embedding, LAYERS,
                                  operand_dtype=jnp.bfloat16))
    assert jnp.allclose(out_bf16, ref, atol=3e-2, rtol=3e-2), (
        f"bf16 max abs err {jnp.max(jnp.abs(out_bf16 - ref))}")

    # 3) Streaming (row-tiled) path, forced, f32, with a forced 2-way column
    #    split to exercise the "parallel" column-block axis.
    N2, D2 = 512, 256
    k2g, k2e = jax.random.split(jax.random.PRNGKey(1))
    graph2 = jax.random.uniform(k2g, (N2, N2), dtype=jnp.float32)
    graph2 = graph2 / jnp.sum(graph2, axis=1, keepdims=True)
    emb2 = jax.random.normal(k2e, (N2, D2), dtype=jnp.float32)
    ref2 = _reference(graph2, emb2, LAYERS)

    out2 = jax.block_until_ready(
        overlap_graph_convolution(graph2, emb2, LAYERS, force_tiled=True,
                                  num_column_blocks=2))
    assert out2.shape == (N2, D2)
    assert jnp.allclose(out2, ref2, atol=2e-3, rtol=2e-3), (
        f"tiled f32 max abs err {jnp.max(jnp.abs(out2 - ref2))}")

    # 4) Streaming path, bf16 streamed graph + bf16 layer carry (auto columns).
    out3 = jax.block_until_ready(
        overlap_graph_convolution(graph2, emb2, LAYERS, force_tiled=True,
                                  operand_dtype=jnp.bfloat16))
    assert jnp.allclose(out3, ref2, atol=5e-2, rtol=5e-2), (
        f"tiled bf16 max abs err {jnp.max(jnp.abs(out3 - ref2))}")

    print("KERNEL_OK")
</pallas_src>

<mosaic_0001>
module attributes {stable_mosaic.version = 11 : i64} {
  func.func @_overlap_gcn_resident_kernel(%arg0: i32, %arg1: memref<64x64xf32, #tpu.memory_space<vmem>>, %arg2: memref<64x128xf32, #tpu.memory_space<vmem>>, %arg3: memref<64x128xf32, #tpu.memory_space<vmem>>) attributes {dimension_semantics = [#tpu.dimension_semantics<arbitrary>], iteration_bounds = array<i64: 1>, scalar_prefetch = 0 : i64, scratch_operands = 0 : i64, tpu.core_type = #tpu.core_type<tc>, window_params = [{pipeline_mode = #tpu.pipeline_mode<synchronous>, transform_indices = @transform_0, window_bounds = array<i64: 64, 64>}, {pipeline_mode = #tpu.pipeline_mode<synchronous>, transform_indices = @transform_1, window_bounds = array<i64: 64, 128>}, {pipeline_mode = #tpu.pipeline_mode<synchronous>, transform_indices = @transform_2, window_bounds = array<i64: 64, 128>}]} {
    %c0 = arith.constant 0 : index
    %c0_0 = arith.constant 0 : index
    %0 = vector.load %arg1[%c0, %c0_0] : memref<64x64xf32, #tpu.memory_space<vmem>>, vector<64x64xf32>
    %c0_1 = arith.constant 0 : index
    %c0_2 = arith.constant 0 : index
    %1 = vector.load %arg2[%c0_1, %c0_2] : memref<64x128xf32, #tpu.memory_space<vmem>>, vector<64x128xf32>
    %c0_3 = arith.constant 0 : index
    %c0_4 = arith.constant 0 : index
    %2 = vector.load %arg3[%c0_3, %c0_4] : memref<64x128xf32, #tpu.memory_space<vmem>>, vector<64x128xf32>
    tpu.vector_store %arg3[%c0_3, %c0_4], %1 {strides = array<i32>} : memref<64x128xf32, #tpu.memory_space<vmem>>, vector<64x128xf32>,
    %cst = arith.constant dense<0.000000e+00> : vector<64x128xf32>
    %3 = tpu.matmul %0, %1, %cst {dimension_numbers = #tpu.dot_dimension_numbers<[1], [0], [0], [1], [0, 0, 1, 1], [], []>} : vector<64x64xf32>, vector<64x128xf32>, vector<64x128xf32> -> vector<64x128xf32>
    %c0_5 = arith.constant 0 : index
    %c0_6 = arith.constant 0 : index
    %4 = vector.load %arg3[%c0_5, %c0_6] : memref<64x128xf32, #tpu.memory_space<vmem>>, vector<64x128xf32>
    %5 = arith.addf %4, %3 : vector<64x128xf32>
    %c0_7 = arith.constant 0 : index
    %c0_8 = arith.constant 0 : index
    %6 = vector.load %arg3[%c0_7, %c0_8] : memref<64x128xf32, #tpu.memory_space<vmem>>, vector<64x128xf32>
    tpu.vector_store %arg3[%c0_7, %c0_8], %5 {strides = array<i32>} : memref<64x128xf32, #tpu.memory_space<vmem>>, vector<64x128xf32>,
    %cst_9 = arith.constant dense<0.000000e+00> : vector<64x128xf32>
    %7 = tpu.matmul %0, %3, %cst_9 {dimension_numbers = #tpu.dot_dimension_numbers<[1], [0], [0], [1], [0, 0, 1, 1], [], []>} : vector<64x64xf32>, vector<64x128xf32>, vector<64x128xf32> -> vector<64x128xf32>
    %c0_10 = arith.constant 0 : index
    %c0_11 = arith.constant 0 : index
    %8 = vector.load %arg3[%c0_10, %c0_11] : memref<64x128xf32, #tpu.memory_space<vmem>>, vector<64x128xf32>
    %9 = arith.addf %8, %7 : vector<64x128xf32>
    %c0_12 = arith.constant 0 : index
    %c0_13 = arith.constant 0 : index
    %10 = vector.load %arg3[%c0_12, %c0_13] : memref<64x128xf32, #tpu.memory_space<vmem>>, vector<64x128xf32>
    tpu.vector_store %arg3[%c0_12, %c0_13], %9 {strides = array<i32>} : memref<64x128xf32, #tpu.memory_space<vmem>>, vector<64x128xf32>,
    %cst_14 = arith.constant dense<0.000000e+00> : vector<64x128xf32>
    %11 = tpu.matmul %0, %7, %cst_14 {dimension_numbers = #tpu.dot_dimension_numbers<[1], [0], [0], [1], [0, 0, 1, 1], [], []>} : vector<64x64xf32>, vector<64x128xf32>, vector<64x128xf32> -> vector<64x128xf32>
    %c0_15 = arith.constant 0 : index
    %c0_16 = arith.constant 0 : index
    %12 = vector.load %arg3[%c0_15, %c0_16] : memref<64x128xf32, #tpu.memory_space<vmem>>, vector<64x128xf32>
    %13 = arith.addf %12, %11 : vector<64x128xf32>
    %c0_17 = arith.constant 0 : index
    %c0_18 = arith.constant 0 : index
    %14 = vector.load %arg3[%c0_17, %c0_18] : memref<64x128xf32, #tpu.memory_space<vmem>>, vector<64x128xf32>
    tpu.vector_store %arg3[%c0_17, %c0_18], %13 {strides = array<i32>} : memref<64x128xf32, #tpu.memory_space<vmem>>, vector<64x128xf32>,
    return
  }
  func.func @transform_0(%arg0: i32) -> (i32, i32) {
    %c0_i32 = arith.constant 0 : i32
    %c0_i32_0 = arith.constant 0 : i32
    %c0_i32_1 = arith.constant 0 : i32
    return %c0_i32, %c0_i32_0 : i32, i32
  }
  func.func @transform_1(%arg0: i32) -> (i32, i32) {
    %c0_i32 = arith.constant 0 : i32
    %c0_i32_0 = arith.constant 0 : i32
    %c0_i32_1 = arith.constant 0 : i32
    return %c0_i32, %c0_i32_0 : i32, i32
  }
  func.func @transform_2(%arg0: i32) -> (i32, i32) {
    %c0_i32 = arith.constant 0 : i32
    %c0_i32_0 = arith.constant 0 : i32
    %c0_i32_1 = arith.constant 0 : i32
    return %c0_i32, %c0_i32_0 : i32, i32
  }
}

</mosaic_0001>

<bundles_post_ra>
// kernel: tpu_custom_call.1
= control target key start
LH: loop header
LB: loop body
LE: loop exit
PB: predicated region body
PF: predicated region fallthrough
CT: control target
= control target key end

     0   :  { %7 = vsyncpa [#allocation3], 0  ;;  %s934_s0 = inlined_call_operand.hbm [shape: f32[64,64], index: 0, kind: input, shape index: {}]   ;;  %s935_s1 = inlined_call_operand.hbm [shape: f32[64,128], index: 1, kind: input, shape index: {}]   ;;  %s936_s2 = inlined_call_operand.hbm [shape: f32[64,128], index: 2, kind: output, shape index: {}]  }
   0x1   :  { %8 = vsyncpa [#allocation6], 0 }
   0x2   :  { %9 = vsyncpa [#allocation4], 0  ;;  %s783_s9 = smov [#allocation2]   ;;  %s711_s13 = scalar_lea.hbm %s934_s0, 1024 }
   0x3   :  { %s15_s10 = sshll.u32 %s783_s9, 4  ;;  %p712_p0 = scmp.ne.s32.totalorder %s934_s0, %s711_s13  ;;  %s16_s10 = int_to_ptr.vmem [resolvable:$true] %s15_s10 }
   0x4   :  { %p715_p1 = scmp.lt.u32.totalorder %s711_s13, %s934_s0 }
   0x6   :  { %p717_p2 = pnand %p715_p1, %p712_p0 }
   0x8   :  { %720 = shalt.err (!%p717_p2)
}
   0x9   :  { %s721_s18 = scalar_lea.vmem %s16_s10, 1024  ;;  %p726_p4 = scmp.lt.s32.totalorder %s16_s10, %s16_s10 }
   0xa   :  { %p722_p3 = scmp.ne.s32.totalorder %s16_s10, %s721_s18  ;;  %p727_p5 = scmp.lt.s32.totalorder %s721_s18, %s721_s18 }
   0xc   :  { %p728_p6 = por %p727_p5, %p726_p4 }
   0xe   :  { %p729_p7 = pnand %p728_p6, %p722_p3 }
  0x10   :  { %732 = shalt.err (!%p729_p7)
}
  0x11   :  { %s784_s19 = smov 128   ;;  %s785_s20 = smov 8  }
  0x12   :  { %21 = dma.hbm_to_vmem [thread:$0]  %s934_s0, 1024, %s16_s10, [#allocation3], %s784_s19, %s784_s19, %s785_s20  }
  0x13   :  { %s786_s23 = smov [#allocation5]   ;;  %s733_s27 = scalar_lea.hbm %s935_s1, 1024 }
  0x14   :  { %s27_s24 = sshll.u32 %s786_s23, 4  ;;  %p734_p8 = scmp.ne.s32.totalorder %s935_s1, %s733_s27  ;;  %s28_s24 = int_to_ptr.vmem [resolvable:$true] %s27_s24 }
  0x15   :  { %p737_p9 = scmp.lt.u32.totalorder %s733_s27, %s935_s1 }
  0x17   :  { %p739_p10 = pnand %p737_p9, %p734_p8 }
  0x19   :  { %742 = shalt.err (!%p739_p10)
}
  0x1a   :  { %s743_s4 = scalar_lea.vmem %s28_s24, 1024  ;;  %p748_p12 = scmp.lt.s32.totalorder %s28_s24, %s28_s24 }
  0x1b   :  { %p744_p11 = scmp.ne.s32.totalorder %s28_s24, %s743_s4  ;;  %p749_p13 = scmp.lt.s32.totalorder %s743_s4, %s743_s4 }
  0x1d   :  { %p750_p0 = por %p749_p13, %p748_p12 }
  0x1f   :  { %p751_p1 = pnand %p750_p0, %p744_p11 }
  0x21   :  { %754 = shalt.err (!%p751_p1)
}
  0x22   :  { %33 = dma.hbm_to_vmem [thread:$0]  %s935_s1, 1024, %s28_s24, [#allocation6], %s784_s19, %s784_s19, %s785_s20  }
  0x23   :  { %777 = dma.done.wait [#allocation3], 1024  }
  0x24   :  { %778 = vsyncadd [#allocation3], 4294966272 }
  0x25   :  { %779 = dma.done.wait [#allocation6], 1024  }
  0x26   :  { %780 = vsyncadd [#allocation6], 4294966272  ;;  %v833_v0 = vld [vmem:[#allocation5] sm:$0xff]  ;;  %v835_v1 = vld [vmem:[#allocation5 + $0x8] sm:$0xff]  ;;  %vm64_vm0 = vcmask 523264   ;;  %s787_s1 = smov [#allocation7]  }
  0x27   :  { %v837_v2 = vld [vmem:[#allocation5 + $0x10] sm:$0xff]  ;;  %v650_v3 = vpack.c.bf16 %v835_v1, %v833_v0  ;;  %v841_v4 = vld [vmem:[#allocation5 + $0x18] sm:$0xff]  ;;  %v845_v6 = vld [vmem:[#allocation5 + $0x20] sm:$0xff]  ;;  %s481_s6 = sshll.u32 %s787_s1, 4  ;;  %s482_s6 = int_to_ptr.vmem [resolvable:$true] %s481_s6 }
  0x28   :  { %v654_v5 = vpack.c.bf16 %v841_v4, %v837_v2  ;;  %v847_v7 = vld [vmem:[#allocation5 + $0x28] sm:$0xff]  ;;  %v40_v8 = vld [vmem:[#allocation2] sm:$0xff]  ;;  %v853_v10 = vld [vmem:[#allocation5 + $0x30] sm:$0xff]  ;;  %s755_s7 = scalar_lea.vmem %s482_s6, 1024  ;;  %p760_p3 = scmp.lt.s32.totalorder %s482_s6, %s482_s6 }
  0x29   :  { %651 = vmatprep.subr.bf16.mxu0 %v650_v3  ;;  %582 = vmatprep.mubr.msk.f32.mxu0 %vm64_vm0, %v40_v8  ;;  %v658_v9 = vpack.c.bf16 %v847_v7, %v845_v6  ;;  %v855_v11 = vld [vmem:[#allocation5 + $0x38] sm:$0xff]  ;;  %v859_v13 = vld [vmem:[#allocation2 + $0x8] sm:$0xff]  ;;  %v861_v14 = vld [vmem:[#allocation2 + $0x10] sm:$0xff]  ;;  %p756_p2 = scmp.ne.s32.totalorder %s482_s6, %s755_s7  ;;  %p761_p4 = scmp.lt.s32.totalorder %s755_s7, %s755_s7 }
  0x2a   :  { %653 = vmatpush3.bf16.msra.mxu0 %v650_v3  ;;  %610 = vmatprep.mubr.msk.f32.mxu1 %vm64_vm0, %v40_v8  ;;  %v662_v12 = vpack.c.bf16 %v855_v11, %v853_v10  ;;  %v867_v15 = vld [vmem:[#allocation2 + $0x18] sm:$0xff]  ;;  %v44_v16 = vld [vmem:[#allocation2 + $0x20] sm:$0xff]  ;;  %v872_v17 = vld [vmem:[#allocation2 + $0x28] sm:$0xff] }
  0x2b   :  { %655 = vmatprep.subr.bf16.mxu0 %v654_v5  ;;  %v874_v18 = vld [vmem:[#allocation2 + $0x30] sm:$0xff]  ;;  %v880_v19 = vld [vmem:[#allocation2 + $0x38] sm:$0xff]  ;;  %p762_p5 = por %p761_p4, %p760_p3 }
  0x2d   :  { %p763_p6 = pnand %p762_p5, %p756_p2 }
  0x2e   :  { %657 = vmatpush3.bf16.msra.mxu0 %v654_v5 }
  0x2f   :  { %659 = vmatprep.subr.bf16.mxu0 %v658_v9 }
  0x32   :  { %661 = vmatpush3.bf16.msra.mxu0 %v658_v9 }
  0x33   :  { %663 = vmatprep.subr.bf16.mxu0 %v662_v12 }
  0x36   :  { %665 = vmatpush3.bf16.msra.mxu0 %v662_v12 }
  0x39   :  { %583 = vmatmul.mubr.msk.f32.vlgmr.msra.gmra.mrb[0].mxu0 %vm64_vm0, %v859_v13 }
  0x3a   :  { %585 = vmatprep.mubr.msk.f32.mxu0 %vm64_vm0, %v861_v14 }
  0x3d   :  { %586 = vmatmul.mubr.msk.f32.gmra.mrb[2].mxu0 %vm64_vm0, %v867_v15 }
  0x3e   :  { %588 = vmatprep.mubr.msk.f32.mxu0 %vm64_vm0, %v44_v16 }
  0x41   :  { %589 = vmatmul.mubr.msk.f32.gmra.mrb[4].mxu0 %vm64_vm0, %v872_v17 }
  0x42   :  { %591 = vmatprep.mubr.msk.f32.mxu0 %vm64_vm0, %v874_v18 }
  0x45   :  { %592 = vmatmul.mubr.msk.f32.gmra.mrb[6].mxu0 %vm64_vm0, %v880_v19 }
  0x46   :  { %638 = vmatprep.mubr.msk.f32.mxu0 %vm64_vm0, %v40_v8 }
 0x10c   :  { %v584_v20 = vpop.f32.mrb[0].mxu0 }
 0x10d   :  { %v155_v21 = vpop.f32.mrb[1].mxu0  ;;  %v203_v32 = vadd.f32 %v584_v20, %v835_v1 }
 0x10e   :  { %v666_v22 = vpack.c.bf16 %v584_v20, %v155_v21  ;;  %v202_v33 = vadd.f32 %v155_v21, %v833_v0 }
 0x110   :  { %v587_v23 = vpop.f32.mrb[2].mxu0  ;;  %667 = vmatprep.subr.bf16.mxu1 %v666_v22 }
 0x111   :  { %v165_v24 = vpop.f32.mrb[3].mxu0  ;;  %669 = vmatpush3.bf16.msra.mxu1 %v666_v22  ;;  %v205_v39 = vadd.f32 %v587_v23, %v841_v4 }
 0x112   :  { %v670_v25 = vpack.c.bf16 %v587_v23, %v165_v24  ;;  %v204_v40 = vadd.f32 %v165_v24, %v837_v2 }
 0x114   :  { %v590_v26 = vpop.f32.mrb[4].mxu0  ;;  %671 = vmatprep.subr.bf16.mxu1 %v670_v25 }
 0x115   :  { %v175_v27 = vpop.f32.mrb[5].mxu0  ;;  %673 = vmatpush3.bf16.msra.mxu1 %v670_v25  ;;  %v207_v46 = vadd.f32 %v590_v26, %v847_v7 }
 0x116   :  { %v674_v28 = vpack.c.bf16 %v590_v26, %v175_v27  ;;  %v206_v47 = vadd.f32 %v175_v27, %v845_v6 }
 0x118   :  { %v593_v29 = vpop.f32.mrb[6].mxu0  ;;  %675 = vmatprep.subr.bf16.mxu1 %v674_v28 }
 0x119   :  { %v185_v30 = vpop.f32.mrb[7].mxu0  ;;  %677 = vmatpush3.bf16.msra.mxu1 %v674_v28  ;;  %v209_v53 = vadd.f32 %v593_v29, %v855_v11 }
 0x11a   :  { %v678_v31 = vpack.c.bf16 %v593_v29, %v185_v30  ;;  %v208_v54 = vadd.f32 %v185_v30, %v853_v10 }
 0x11c   :  { %679 = vmatprep.subr.bf16.mxu1 %v678_v31 }
 0x11d   :  { %681 = vmatpush3.bf16.msra.mxu1 %v678_v31 }
 0x120   :  { %611 = vmatmul.mubr.msk.f32.vlgmr.msra.gmra.mrb[0].mxu1 %vm64_vm0, %v859_v13 }
 0x121   :  { %613 = vmatprep.mubr.msk.f32.mxu1 %vm64_vm0, %v861_v14 }
 0x124   :  { %614 = vmatmul.mubr.msk.f32.gmra.mrb[2].mxu1 %vm64_vm0, %v867_v15 }
 0x125   :  { %616 = vmatprep.mubr.msk.f32.mxu1 %vm64_vm0, %v44_v16 }
 0x128   :  { %617 = vmatmul.mubr.msk.f32.gmra.mrb[4].mxu1 %vm64_vm0, %v872_v17 }
 0x129   :  { %619 = vmatprep.mubr.msk.f32.mxu1 %vm64_vm0, %v874_v18 }
 0x12c   :  { %620 = vmatmul.mubr.msk.f32.gmra.mrb[6].mxu1 %vm64_vm0, %v880_v19 }
 0x12d   :  { %644 = vmatprep.mubr.msk.f32.mxu1 %vm64_vm0, %v44_v16 }
 0x1f3   :  { %v612_v34 = vpop.f32.mrb[0].mxu1 }
 0x1f4   :  { %v332_v35 = vadd.f32 %v612_v34, %v203_v32  ;;  %v284_v36 = vpop.f32.mrb[1].mxu1 }
 0x1f5   :  { %v331_v37 = vadd.f32 %v284_v36, %v202_v33  ;;  %v682_v38 = vpack.c.bf16 %v612_v34, %v284_v36 }
 0x1f7   :  { %v615_v41 = vpop.f32.mrb[2].mxu1  ;;  %683 = vmatprep.subr.bf16.mxu0 %v682_v38  ;;  %698 = vmatprep.subr.bf16.mxu1 %v682_v38 }
 0x1f8   :  { %v334_v42 = vadd.f32 %v615_v41, %v205_v39  ;;  %v294_v43 = vpop.f32.mrb[3].mxu1  ;;  %685 = vmatpush3.bf16.msra.mxu0 %v682_v38  ;;  %702 = vmatpush3.bf16.msra.mxu1 %v682_v38 }
 0x1f9   :  { %v333_v44 = vadd.f32 %v294_v43, %v204_v40  ;;  %v686_v45 = vpack.c.bf16 %v615_v41, %v294_v43 }
 0x1fb   :  { %v618_v48 = vpop.f32.mrb[4].mxu1  ;;  %687 = vmatprep.subr.bf16.mxu0 %v686_v45  ;;  %699 = vmatprep.subr.bf16.mxu1 %v686_v45 }
 0x1fc   :  { %v336_v49 = vadd.f32 %v618_v48, %v207_v46  ;;  %v304_v50 = vpop.f32.mrb[5].mxu1  ;;  %689 = vmatpush3.bf16.msra.mxu0 %v686_v45  ;;  %703 = vmatpush3.bf16.msra.mxu1 %v686_v45 }
 0x1fd   :  { %v335_v51 = vadd.f32 %v304_v50, %v206_v47  ;;  %v690_v52 = vpack.c.bf16 %v618_v48, %v304_v50 }
 0x1ff   :  { %v621_v55 = vpop.f32.mrb[6].mxu1  ;;  %691 = vmatprep.subr.bf16.mxu0 %v690_v52  ;;  %700 = vmatprep.subr.bf16.mxu1 %v690_v52 }
 0x200   :  { %v338_v56 = vadd.f32 %v621_v55, %v209_v53  ;;  %v314_v57 = vpop.f32.mrb[7].mxu1  ;;  %693 = vmatpush3.bf16.msra.mxu0 %v690_v52  ;;  %704 = vmatpush3.bf16.msra.mxu1 %v690_v52 }
 0x201   :  { %v337_v58 = vadd.f32 %v314_v57, %v208_v54  ;;  %v694_v59 = vpack.c.bf16 %v621_v55, %v314_v57 }
 0x203   :  { %695 = vmatprep.subr.bf16.mxu0 %v694_v59  ;;  %701 = vmatprep.subr.bf16.mxu1 %v694_v59 }
 0x204   :  { %697 = vmatpush3.bf16.msra.mxu0 %v694_v59  ;;  %705 = vmatpush3.bf16.msra.mxu1 %v694_v59 }
 0x207   :  { %639 = vmatmul.mubr.msk.f32.vlgmr.msra.gmra.mrb[8].mxu0 %vm64_vm0, %v859_v13  ;;  %645 = vmatmul.mubr.msk.f32.vlgmr.msra.gmra.mrb[8].mxu1 %vm64_vm0, %v872_v17 }
 0x208   :  { %641 = vmatprep.mubr.msk.f32.mxu0 %vm64_vm0, %v861_v14  ;;  %647 = vmatprep.mubr.msk.f32.mxu1 %vm64_vm0, %v874_v18 }
 0x20b   :  { %642 = vmatmul.mubr.msk.f32.gmra.mrb[10].mxu0 %vm64_vm0, %v867_v15  ;;  %648 = vmatmul.mubr.msk.f32.gmra.mrb[10].mxu1 %vm64_vm0, %v880_v19 }
 0x2da   :  { %v640_v60 = vpop.f32.mrb[8].mxu0  ;;  %v646_v61 = vpop.f32.mrb[8].mxu1 }
 0x2db   :  { %v461_v62 = vadd.f32 %v640_v60, %v332_v35  ;;  %v465_v63 = vadd.f32 %v646_v61, %v336_v49  ;;  %v413_v0 = vpop.f32.mrb[9].mxu0  ;;  %v433_v1 = vpop.f32.mrb[9].mxu1 }
 0x2dc   :  { %v460_v2 = vadd.f32 %v413_v0, %v331_v37  ;;  %v464_v3 = vadd.f32 %v433_v1, %v335_v51 }
 0x2dd   :  { %469 = vst [vmem:[#allocation7 + $0x8] sm:$0xff] %v461_v62  ;;  %473 = vst [vmem:[#allocation7 + $0x28] sm:$0xff] %v465_v63 }
 0x2de   :  { %468 = vst [vmem:[#allocation7] sm:$0xff] %v460_v2  ;;  %472 = vst [vmem:[#allocation7 + $0x20] sm:$0xff] %v464_v3  ;;  %v643_v4 = vpop.f32.mrb[10].mxu0  ;;  %v649_v5 = vpop.f32.mrb[10].mxu1 }
 0x2df   :  { %v463_v6 = vadd.f32 %v643_v4, %v334_v42  ;;  %v467_v7 = vadd.f32 %v649_v5, %v338_v56  ;;  %v423_v8 = vpop.f32.mrb[11].mxu0  ;;  %v443_v9 = vpop.f32.mrb[11].mxu1 }
 0x2e0   :  { %v462_v10 = vadd.f32 %v423_v8, %v333_v44  ;;  %v466_v11 = vadd.f32 %v443_v9, %v337_v58 }
 0x2e1   :  { %471 = vst [vmem:[#allocation7 + $0x18] sm:$0xff] %v463_v6  ;;  %475 = vst [vmem:[#allocation7 + $0x38] sm:$0xff] %v467_v7 }
 0x2e2   :  { %470 = vst [vmem:[#allocation7 + $0x10] sm:$0xff] %v462_v10  ;;  %474 = vst [vmem:[#allocation7 + $0x30] sm:$0xff] %v466_v11 }
 0x2e3   :  { %766 = shalt.err (!%p763_p6)
}
 0x2e4   :  { %s767_s10 = scalar_lea.hbm %s936_s2, 1024 }
 0x2e5   :  { %p768_p7 = scmp.ne.s32.totalorder %s936_s2, %s767_s10  ;;  %p771_p8 = scmp.lt.u32.totalorder %s767_s10, %s936_s2 }
 0x2e7   :  { %p773_p9 = pnand %p771_p8, %p768_p7 }
 0x2e9   :  { %776 = shalt.err (!%p773_p9)
}
 0x2ea   :  { %487 = dma.vmem_to_hbm [thread:$0]  %s482_s6, 1024, %s936_s2, [#allocation4], %s784_s19, %s784_s19, %s785_s20  }
 0x2eb   :  { %781 = dma.done.wait [#allocation4], 1024  }
 0x2ec   :  { %782 = vsyncadd [#allocation4], 4294966272 }
 0x2ed   :  { %491 = vsyncpa [#allocation3], 1 }
 0x2ee   :  { %492 = vsyncpa [#allocation6], 1 }
 0x2ef   :  { %493 = vsyncpa [#allocation4], 1 }

</bundles_post_ra>
